<compile_context>
chip_gen: v7x
topology: tpu7x:2x2x1
jax: 0.10.0
libtpu: 0.0.40
codegen_flags: <defaults>
</compile_context>

<pallas_src>
import functools
import math

import jax
import jax.numpy as jnp
from jax.experimental import pallas as pl
from jax.experimental.pallas import tpu as pltpu


def _round_up(x, m):
    return ((x + m - 1) // m) * m


def _embed_gather_kernel(ids_ref, lut_hbm, out_ref, gather_buf, copy_sem, *,
                         token_tile, scale):
    """Gather `token_tile` rows of the HBM-resident LUT into VMEM, scale, store.

    ids_ref   : SMEM (n_padded,) int32        -- scalar-prefetched token ids
    lut_hbm   : HBM  (vocab, d_model_p) f32   -- embedding table (never tiled)
    out_ref   : VMEM (token_tile, d_model_p)  -- output tile
    gather_buf: VMEM (token_tile, d_model_p)  -- DMA landing buffer (scratch)
    copy_sem  : DMA semaphore shared by all equal-sized row copies of this tile
    """
    base = pl.program_id(0) * token_tile

    # Issue one row DMA per token in the tile (all in flight at once).
    @pl.loop(0, token_tile)
    def _start(t):
        tok = ids_ref[base + t]
        pltpu.make_async_copy(
            lut_hbm.at[pl.ds(tok, 1), :],
            gather_buf.at[pl.ds(t, 1), :],
            copy_sem,
        ).start()

    # Wait for all of them; each wait retires one equal-sized row copy, so after
    # this loop every row of gather_buf is valid.
    @pl.loop(0, token_tile)
    def _wait(t):
        tok = ids_ref[base + t]
        pltpu.make_async_copy(
            lut_hbm.at[pl.ds(tok, 1), :],
            gather_buf.at[pl.ds(t, 1), :],
            copy_sem,
        ).wait()

    # Fused sqrt(d_model) scale; single lane-dense full-tile store.
    out_ref[...] = gather_buf[...] * scale


def embeddings_forward(x, lut, *, token_tile=256):
    """x: (B, S) integer ids; lut: (vocab, d_model) f32. Returns (B, S, d_model) f32."""
    b, s = x.shape
    vocab, d_model = lut.shape
    assert vocab < 2 ** 31, "token ids are handled as int32"
    scale = math.sqrt(d_model)

    n = b * s

    # Lane-dense output: pad d_model up to a multiple of 128 (no-op when aligned).
    d_model_p = _round_up(d_model, 128)
    lut_p = lut.astype(jnp.float32)
    if d_model_p != d_model:
        lut_p = jnp.pad(lut_p, ((0, 0), (0, d_model_p - d_model)))

    # Token tiling: multiple of 8 sublanes, capped by the (padded) token count.
    tt = min(token_tile, _round_up(n, 8))
    tt = max(8, (tt // 8) * 8)
    n_p = _round_up(n, tt)

    ids = x.reshape(-1).astype(jnp.int32)
    # Clamp out-of-range ids: nn.Embedding would raise; an unchecked id would be
    # an out-of-bounds DMA source.  Padded tail tokens gather row 0 harmlessly.
    ids = jnp.clip(ids, 0, vocab - 1)
    if n_p != n:
        ids = jnp.pad(ids, (0, n_p - n))

    grid = (n_p // tt,)

    cost = pl.CostEstimate(
        flops=n_p * d_model_p,                                   # the scale multiply
        transcendentals=0,
        bytes_accessed=2 * n_p * d_model_p * 4 + n_p * 4,        # rows read + out written + ids
    )

    out_flat = pl.pallas_call(
        functools.partial(_embed_gather_kernel, token_tile=tt, scale=scale),
        out_shape=jax.ShapeDtypeStruct((n_p, d_model_p), jnp.float32),
        grid_spec=pltpu.PrefetchScalarGridSpec(
            num_scalar_prefetch=1,                               # ids -> SMEM
            grid=grid,
            in_specs=[pl.BlockSpec(memory_space=pl.ANY)],        # LUT stays in HBM
            out_specs=pl.BlockSpec((tt, d_model_p), lambda i, ids: (i, 0)),
            scratch_shapes=[
                pltpu.VMEM((tt, d_model_p), jnp.float32),        # gather landing buffer
                pltpu.SemaphoreType.DMA(()),                     # shared row-copy semaphore
            ],
        ),
        compiler_params=pltpu.CompilerParams(
            dimension_semantics=("parallel",),                   # token tiles are independent
        ),
        cost_estimate=cost,
    )(ids, lut_p)

    return out_flat[:n, :d_model].reshape(b, s, d_model)


if __name__ == "__main__":
    # Small, deterministic setup consistent with the module: vocab=16, d_model=32.
    B, S = 2, 8
    VOCAB, D_MODEL = 16, 32

    key = jax.random.PRNGKey(0)
    k_lut, k_ids = jax.random.split(key)

    # nn.Embedding default init: weights ~ N(0, 1)
    lut = jax.random.normal(k_lut, (VOCAB, D_MODEL), dtype=jnp.float32)
    x = jax.random.randint(k_ids, (B, S), 0, VOCAB, dtype=jnp.int32)

    out = embeddings_forward(x, lut)
    out = jax.block_until_ready(out)

    # Pure-JAX reference check of the forward semantics.
    ref = lut[x] * math.sqrt(D_MODEL)
    assert out.shape == (B, S, D_MODEL)
    assert jnp.allclose(out, ref, atol=1e-5, rtol=1e-5)

    print("KERNEL_OK")
</pallas_src>

<mosaic_0001>
module attributes {stable_mosaic.version = 11 : i64} {
  func.func @_embed_gather_kernel(%arg0: i32, %arg1: memref<16xi32, #tpu.memory_space<smem>>, %arg2: memref<16x128xf32, #tpu.memory_space<any>>, %arg3: memref<16x128xf32, #tpu.memory_space<vmem>>, %arg4: memref<16x128xf32, #tpu.memory_space<vmem>>, %arg5: memref<!tpu.dma_semaphore, #tpu.memory_space<semaphore_mem>>) attributes {dimension_semantics = [#tpu.dimension_semantics<parallel>], iteration_bounds = array<i64: 1>, scalar_prefetch = 1 : i64, scratch_operands = 2 : i64, tpu.core_type = #tpu.core_type<tc>, window_params = [{}, {transform_indices = @transform_1, window_bounds = array<i64: 16, 128>}]} {
    %c16_i32 = arith.constant 16 : i32
    %0 = arith.muli %arg0, %c16_i32 : i32
    %c0_i32 = arith.constant 0 : i32
    %c16_i32_0 = arith.constant 16 : i32
    %1 = arith.addi %c0_i32, %c16_i32_0 : i32
    %c1_i32 = arith.constant 1 : i32
    scf.for %arg6 = %c0_i32 to %1 step %c1_i32  : i32 {
      %c1_i32_9 = arith.constant 1 : i32
      %7 = arith.muli %arg6, %c1_i32_9 : i32
      %c0_i32_10 = arith.constant 0 : i32
      %8 = arith.addi %c0_i32_10, %7 : i32
      %9 = arith.addi %0, %8 : i32
      %10 = arith.index_cast %9 : i32 to index
      %11 = memref.load %arg1[%10] : memref<16xi32, #tpu.memory_space<smem>>
      %c0_i32_11 = arith.constant 0 : i32
      %12 = tpu.memref_slice %arg2[%11, %c0_i32_11] : memref<16x128xf32, #tpu.memory_space<any>> -> memref<1x128xf32, #tpu.memory_space<any>>
      %c0_i32_12 = arith.constant 0 : i32
      %13 = tpu.memref_slice %arg4[%8, %c0_i32_12] : memref<16x128xf32, #tpu.memory_space<vmem>> -> memref<1x128xf32, #tpu.memory_space<vmem>>
      tpu.enqueue_dma source(%12 : memref<1x128xf32, #tpu.memory_space<any>>) target(%13 : memref<1x128xf32, #tpu.memory_space<vmem>>) target_semaphore(%arg5 : memref<!tpu.dma_semaphore, #tpu.memory_space<semaphore_mem>>)
    }
    %c16_i32_1 = arith.constant 16 : i32
    %c0_i32_2 = arith.constant 0 : i32
    %c16_i32_3 = arith.constant 16 : i32
    %2 = arith.addi %c0_i32_2, %c16_i32_3 : i32
    %c1_i32_4 = arith.constant 1 : i32
    scf.for %arg6 = %c0_i32_2 to %2 step %c1_i32_4  : i32 {
      %c1_i32_9 = arith.constant 1 : i32
      %7 = arith.muli %arg6, %c1_i32_9 : i32
      %c0_i32_10 = arith.constant 0 : i32
      %8 = arith.addi %c0_i32_10, %7 : i32
      %9 = arith.addi %0, %8 : i32
      %10 = arith.index_cast %9 : i32 to index
      %11 = memref.load %arg1[%10] : memref<16xi32, #tpu.memory_space<smem>>
      %c0_i32_11 = arith.constant 0 : i32
      %12 = tpu.memref_slice %arg2[%11, %c0_i32_11] : memref<16x128xf32, #tpu.memory_space<any>> -> memref<1x128xf32, #tpu.memory_space<any>>
      %c0_i32_12 = arith.constant 0 : i32
      %13 = tpu.memref_slice %arg4[%8, %c0_i32_12] : memref<16x128xf32, #tpu.memory_space<vmem>> -> memref<1x128xf32, #tpu.memory_space<vmem>>
      tpu.wait_dma2 semaphore(%arg5 : memref<!tpu.dma_semaphore, #tpu.memory_space<semaphore_mem>>) src(%12 : memref<1x128xf32, #tpu.memory_space<any>>) dst(%13 : memref<1x128xf32, #tpu.memory_space<vmem>>)
    }
    %c16_i32_5 = arith.constant 16 : i32
    %c0 = arith.constant 0 : index
    %c0_6 = arith.constant 0 : index
    %3 = vector.load %arg4[%c0, %c0_6] : memref<16x128xf32, #tpu.memory_space<vmem>>, vector<16x128xf32>
    %cst = arith.constant 5.65685415 : f32
    %4 = vector.broadcast %cst : f32 to vector<16x128xf32>
    %5 = arith.mulf %3, %4 : vector<16x128xf32>
    %c0_7 = arith.constant 0 : index
    %c0_8 = arith.constant 0 : index
    %6 = vector.load %arg3[%c0_7, %c0_8] : memref<16x128xf32, #tpu.memory_space<vmem>>, vector<16x128xf32>
    tpu.vector_store %arg3[%c0_7, %c0_8], %5 {strides = array<i32>} : memref<16x128xf32, #tpu.memory_space<vmem>>, vector<16x128xf32>,
    return
  }
  func.func @transform_1(%arg0: i32, %arg1: memref<16xi32, #tpu.memory_space<smem>>) -> (i32, i32) {
    %c0_i32 = arith.constant 0 : i32
    %c0_i32_0 = arith.constant 0 : i32
    return %arg0, %c0_i32 : i32, i32
  }
}

</mosaic_0001>

<bundles_post_ra>
// kernel: tpu_custom_call.1
= control target key start
LH: loop header
LB: loop body
LE: loop exit
PB: predicated region body
PF: predicated region fallthrough
CT: control target
= control target key end

     0   :  { %s250_s0 = inlined_call_operand.hbm [shape: s32[16], index: 0, kind: input, shape index: {}]   ;;  %s251_s1 = inlined_call_operand.hbm [shape: f32[16,128], index: 1, kind: input, shape index: {}]   ;;  %s252_s2 = inlined_call_operand.hbm [shape: f32[16,128], index: 2, kind: output, shape index: {}]  }
   0x1   :  { %s109_s11 = scalar_lea.hbm %s250_s0, 16 }
   0x2   :  { %p110_p0 = scmp.ne.s32.totalorder %s250_s0, %s109_s11  ;;  %p113_p1 = scmp.lt.u32.totalorder %s109_s11, %s250_s0 }
   0x4   :  { %p115_p2 = pnand %p113_p1, %p110_p0 }
   0x6   :  { %118 = shalt.err (!%p115_p2)  }
   0x7   :  { %s187_s16 = smov [#allocation5]  }
   0x8   :  { %8 = dma.hbm_to_smem %s250_s0, 16, %s187_s16, [#allocation4] }
   0x9   :  { %173 = dma.done.wait [#allocation4], 16 }
   0xa   :  { %174 = vsyncadd [#allocation4], 4294967280 }
   0xb   :  { %10 = sfence }
   0xc   :  { %11 = vsyncpa [#allocation7], 0  ;;  %s219_s19 = smov 0  }
   0xd LB: > { %s20_s20 = sld [smem:[#allocation5 + %s181_s19]]  ;;  %s23_s21 = scalar_lea.vmem [#allocation2], %s181_s19  ;;  %s181_s19 = sphi %s219_s19, %s18_s19  }
   0xe   : > { %s31_s22 = sshll.u32 %s23_s21, 4  ;;  %s121_s29 = scalar_lea.hbm %s251_s1, 256  ;;  %s32_s22 = int_to_ptr.vmem [resolvable:$true] %s31_s22 }
  0x13   : > { %s87_s23 = sshll.u32 %s20_s20, 4 }
  0x14   : > { %s22_s25 = scalar_lea.hbm %s251_s1, %s87_s23 }
  0x15   : > { %s119_s26 = scalar_lea.hbm %s22_s25, 16  ;;  %p122_p4 = scmp.lt.u32.totalorder %s22_s25, %s251_s1 }
  0x16   : > { %p120_p3 = scmp.ne.s32.totalorder %s22_s25, %s119_s26  ;;  %p123_p5 = scmp.lt.u32.totalorder %s121_s29, %s119_s26 }
  0x17   : > { %p125_p7 = scmp.lt.u32.totalorder %s119_s26, %s22_s25 }
  0x18   : > { %p124_p6 = por %p123_p5, %p122_p4 }
  0x1a   : > { %p126_p8 = por %p125_p7, %p124_p6 }
  0x1c   : > { %p127_p9 = pnand %p126_p8, %p120_p3 }
  0x1e   : > { %130 = shalt.err (!%p127_p9)  }
  0x1f   : > { %s131_s4 = scalar_lea.vmem %s32_s22, 16  ;;  %s188_s5 = smov [#allocation2]  }
  0x20   : > { %p132_p10 = scmp.ne.s32.totalorder %s32_s22, %s131_s4  ;;  %s133_s6 = sshll.u32 %s188_s5, 4  ;;  %s134_s6 = int_to_ptr.vmem [resolvable:$false] %s133_s6 }
  0x21   : > { %s135_s7 = scalar_lea.vmem %s134_s6, 256  ;;  %p136_p11 = scmp.lt.s32.totalorder %s32_s22, %s134_s6 }
  0x22   : > { %p137_p12 = scmp.lt.s32.totalorder %s135_s7, %s131_s4 }
  0x24   : > { %p138_p13 = por %p137_p12, %p136_p11 }
  0x26   : > { %p139_p0 = pnand %p138_p13, %p132_p10 }
  0x28   : > { %142 = shalt.err (!%p139_p0)  }
  0x29   : > { %34 = dma.hbm_to_vmem [thread:$0]  %s22_s25, 16, %s32_s22, [#allocation3] }
  0x2a   : > { %s18_s19 = sadd.s32 1, %s181_s19  }
  0x2b   : > { %p15_p1 = scmp.ge.s32.totalorder %s18_s19, 16  }
  0x2c   :  { %s183_s8 = smov (%p15_p1), 0  }
  0x2d   :  { %17 = sbr.rel (!%p15_p1) target bundleno = 13 (0xd), region = 40 }
  0x34 LB: > { %175 = dma.done.wait [#allocation3], 16  ;;  %s185_s8 = sphi %s183_s8, %s40_s8  }
  0x35   : > { %176 = vsyncadd [#allocation3], 4294967280  ;;  %s40_s8 = sadd.s32 1, %s185_s8  }
  0x36   : > { %p37_p2 = scmp.ge.s32.totalorder %s40_s8, 16  }
  0x37   :  { %v46_v0 = vld [vmem:[#allocation2] sm:$0xff] (%p37_p2)  ;;  %v47_v1 = vld [vmem:[#allocation2 + $0x8] sm:$0xff] (%p37_p2)  ;;  %s189_s9 = smov (%p37_p2), [#allocation6]  }
  0x38   :  { %39 = sbr.rel (!%p37_p2) target bundleno = 52 (0x34), region = 51  ;;  %v48_v2 = vmul.f32 (%p37_p2), 5.656854, %v46_v0  ;;  %v49_v3 = vmul.f32 (%p37_p2), 5.656854, %v47_v1  ;;  %s57_s10 = sshll.u32 (%p37_p2), %s189_s9, 4  ;;  %s58_s10 = int_to_ptr.vmem [resolvable:$true] %s57_s10 }
  0x39   :  { %s143_s11 = scalar_lea.vmem (%p37_p2), %s58_s10, 256  ;;  %p148_p4 = scmp.lt.s32.totalorder (%p37_p2), %s58_s10, %s58_s10 }
  0x3a   :  { %50 = vst [vmem:[#allocation6] sm:$0xff] (%p37_p2), %v48_v2  ;;  %51 = vst [vmem:[#allocation6 + $0x8] sm:$0xff] (%p37_p2), %v49_v3  ;;  %p144_p3 = scmp.ne.s32.totalorder (%p37_p2), %s58_s10, %s143_s11  ;;  %p149_p5 = scmp.lt.s32.totalorder (%p37_p2), %s143_s11, %s143_s11 }
  0x3c   :  { %p150_p6 = por (%p37_p2), %p149_p5, %p148_p4 }
  0x3e   :  { %p151_p7 = pnand (%p37_p2), %p150_p6, %p144_p3 }
  0x40   :  { %154 = shalt.err (!%p151_p7)
}
  0x41   :  { %s155_s13 = scalar_lea.hbm %s252_s2, 256 }
  0x42   :  { %p156_p8 = scmp.ne.s32.totalorder %s252_s2, %s155_s13  ;;  %p159_p9 = scmp.lt.u32.totalorder %s155_s13, %s252_s2 }
  0x44   :  { %p161_p10 = pnand %p159_p9, %p156_p8 }
  0x46   :  { %164 = shalt.err (!%p161_p10)
}
  0x47   :  { %s190_s18 = smov 128   ;;  %s191_s19 = smov 8  }
  0x48   :  { %63 = dma.vmem_to_hbm [thread:$0]  %s58_s10, 256, %s252_s2, [#allocation7], %s190_s18, %s190_s18, %s191_s19  }
  0x49   :  { %177 = dma.done.wait [#allocation7], 256  }
  0x4a   :  { %178 = vsyncadd [#allocation7], 4294967040 }
  0x4b   :  { %67 = vsyncpa [#allocation7], 1 }
  0x4c   :  { %68 = vsyncmov [#allocation3] }
  0x4f   :  { %s69_s22 = vpop.sfrf %68 }
  0x50   :  { %p88_p11 = scmp.ne.s32.totalorder %s69_s22, 0 }
  0x52   :  { %73 = shalt.err (%p88_p11)  }

</bundles_post_ra>
